<compile_context>
chip_gen: v6e
topology: v6e:2x2x1
jax: 0.10.0
libtpu: 0.0.40
codegen_flags: <defaults>
</compile_context>

<pallas_src>
import functools

import jax
import jax.numpy as jnp
from jax.experimental import pallas as pl
from jax.experimental.pallas import tpu as pltpu

H = 256          # feature width (fixed by the module)
HID = 128        # value/advantage hidden width (fixed by the module)
OUT_PAD = 128    # lane-dense padded output width
W_COLS = 4 * H - HID  # 896 = 256 + 256 + 256 + 128


def _round_up(n, m):
    return ((n + m - 1) // m) * m


# ----------------------------------------------------------------------------
# Kernel: 4 matmuls; dueling combine is pre-folded into the last weight block.
# ----------------------------------------------------------------------------
def dueling_dqn_kernel(x_ref, w_ref, b_ref, out_ref):
    wdt = w_ref.dtype

    # feature layer 0: (TB, 256) @ (256, 256)  (x zero-padded on lanes; W1 rows
    # beyond state_dim are zero, so the product equals x @ W1)
    h = jnp.dot(x_ref[...].astype(wdt), w_ref[:, 0:256],
                preferred_element_type=jnp.float32) + b_ref[:, 0:256]
    h = jnp.maximum(h, 0.0)

    # feature layer 2: (TB, 256) @ (256, 256)
    h = jnp.dot(h.astype(wdt), w_ref[:, 256:512],
                preferred_element_type=jnp.float32) + b_ref[:, 256:512]
    h = jnp.maximum(h, 0.0)

    # fused value||advantage hidden layer: (TB, 256) @ (256, 256) -> [vh | ah]
    h = jnp.dot(h.astype(wdt), w_ref[:, 512:768],
                preferred_element_type=jnp.float32) + b_ref[:, 512:768]
    h = jnp.maximum(h, 0.0)

    # fused head: (TB, 256) @ (256, 128) -> Q = V + (A - mean(A)) in lanes
    # [0:action_dim), zeros elsewhere (lane-dense unmasked store).
    q = jnp.dot(h.astype(wdt), w_ref[:, 768:896],
                preferred_element_type=jnp.float32) + b_ref[:, 768:896]
    out_ref[...] = q.astype(out_ref.dtype)


# ----------------------------------------------------------------------------
# Wrapper
# ----------------------------------------------------------------------------
@functools.partial(jax.jit, static_argnames=("action_dim",))
def dueling_dqn_forward(x, w_slab, b_slab, *, action_dim):
    B, state_dim = x.shape

    # Batch padding / tiling: sublane-multiple, grid over batch ("parallel").
    TB = min(256, _round_up(B, 8))
    Bp = _round_up(B, TB)

    # Zero-pad x to (Bp, 256) so it matmuls against the zero-padded W1 block.
    x_pad = jnp.zeros((Bp, H), jnp.float32).at[:B, :state_dim].set(
        x.astype(jnp.float32))

    out = pl.pallas_call(
        dueling_dqn_kernel,
        out_shape=jax.ShapeDtypeStruct((Bp, OUT_PAD), jnp.float32),
        grid=(Bp // TB,),
        in_specs=[
            pl.BlockSpec((TB, H), lambda i: (i, 0)),        # x tile
            pl.BlockSpec((H, W_COLS), lambda i: (0, 0)),    # weight slab (resident)
            pl.BlockSpec((1, W_COLS), lambda i: (0, 0)),    # bias slab (resident)
        ],
        out_specs=pl.BlockSpec((TB, OUT_PAD), lambda i: (i, 0)),
        compiler_params=pltpu.CompilerParams(
            dimension_semantics=("parallel",),
        ),
    )(x_pad, w_slab, b_slab)

    return out[:B, :action_dim]


# ----------------------------------------------------------------------------
# Parameter init (PyTorch-style) and one-time packing into the two slabs.
# ----------------------------------------------------------------------------
def init_raw_params(key, state_dim, action_dim):
    """PyTorch nn.Linear-style init. Weights stored (in, out); biases (1, out)."""
    def linear(k, fan_in, fan_out):
        kw, kb = jax.random.split(k)
        bound = 1.0 / jnp.sqrt(fan_in)
        w = jax.random.uniform(kw, (fan_in, fan_out), jnp.float32, -bound, bound)
        b = jax.random.uniform(kb, (1, fan_out), jnp.float32, -bound, bound)
        return w, b

    keys = jax.random.split(key, 6)
    w1, b1 = linear(keys[0], state_dim, H)
    w2, b2 = linear(keys[1], H, H)
    wv1, bv1 = linear(keys[2], H, HID)
    wv2, bv2 = linear(keys[3], HID, 1)
    wa1, ba1 = linear(keys[4], H, HID)
    wa2, ba2 = linear(keys[5], HID, action_dim)
    return (w1, b1, w2, b2, wv1, bv1, wv2, bv2, wa1, ba1, wa2, ba2)


def pack_params(raw, state_dim, action_dim, dtype=jnp.float32):
    """Pack all layers into (256, 896) weight slab + (1, 896) bias slab.

    The dueling combine Q = V + (A - mean_a A) is linear in [vh | ah], so it is
    folded into the last (256, 128) weight block:
        rows 0:128   col j<act : wv2                      (adds V to every action)
        rows 128:256 col j<act : wa2[:, j] - mean_k wa2   (A - mean(A) weight part)
        bias         col j<act : bv2 + ba2[j] - mean(ba2)
    Columns >= action_dim are zero (lane padding, sliced off by the wrapper).
    """
    (w1, b1, w2, b2, wv1, bv1, wv2, bv2, wa1, ba1, wa2, ba2) = raw

    # Fused stream hidden layer.
    w3 = jnp.concatenate([wv1, wa1], axis=1)            # (256, 256)
    b3 = jnp.concatenate([bv1, ba1], axis=1)            # (1, 256)

    # Fused dueling head, padded to 128 lanes.
    pad = OUT_PAD - action_dim
    wa2_c = wa2 - jnp.mean(wa2, axis=1, keepdims=True)  # (128, act)
    top = jnp.concatenate(
        [jnp.tile(wv2, (1, action_dim)), jnp.zeros((HID, pad), jnp.float32)],
        axis=1)                                          # (128, 128)
    bot = jnp.concatenate(
        [wa2_c, jnp.zeros((HID, pad), jnp.float32)], axis=1)  # (128, 128)
    w4 = jnp.concatenate([top, bot], axis=0)             # (256, 128)
    b4 = jnp.concatenate(
        [bv2 + ba2 - jnp.mean(ba2, axis=1, keepdims=True),
         jnp.zeros((1, pad), jnp.float32)], axis=1)       # (1, 128)

    # W1 with rows zero-padded to 256 (matches the lane-padded x).
    w1p = jnp.zeros((H, H), jnp.float32).at[:state_dim, :].set(w1)

    w_slab = jnp.concatenate([w1p, w2, w3, w4], axis=1).astype(dtype)   # (256, 896)
    b_slab = jnp.concatenate([b1, b2, b3, b4], axis=1).astype(jnp.float32)  # (1, 896)
    return w_slab, b_slab


# ----------------------------------------------------------------------------
# Plain-JAX reference mirroring the PyTorch module exactly (unfused).
# ----------------------------------------------------------------------------
def reference_forward(x, raw):
    (w1, b1, w2, b2, wv1, bv1, wv2, bv2, wa1, ba1, wa2, ba2) = raw
    h = jnp.maximum(x @ w1 + b1, 0.0)
    f = jnp.maximum(h @ w2 + b2, 0.0)
    v = jnp.maximum(f @ wv1 + bv1, 0.0) @ wv2 + bv2
    a = jnp.maximum(f @ wa1 + ba1, 0.0) @ wa2 + ba2
    return v + (a - a.mean(axis=1, keepdims=True))


if __name__ == "__main__":
    key = jax.random.PRNGKey(0)
    k_params, k_x = jax.random.split(key)

    batch = 4
    state_dim = 16
    action_dim = 8

    raw = init_raw_params(k_params, state_dim, action_dim)
    # f32 slabs here for an exact check; pass dtype=jnp.bfloat16 for v6e/v7x
    # training-size runs (matmuls in bf16, elementwise stays f32).
    w_slab, b_slab = pack_params(raw, state_dim, action_dim, dtype=jnp.float32)

    x = jax.random.normal(k_x, (batch, state_dim), dtype=jnp.float32)

    q = dueling_dqn_forward(x, w_slab, b_slab, action_dim=action_dim)
    q = jax.block_until_ready(q)

    q_ref = reference_forward(x, raw)
    assert q.shape == (batch, action_dim)
    assert jnp.allclose(q, q_ref, atol=1e-4, rtol=1e-4), (
        f"max abs err {jnp.max(jnp.abs(q - q_ref))}"
    )

    print("KERNEL_OK")
</pallas_src>

<mosaic_0001>
module attributes {stable_mosaic.version = 11 : i64} {
  func.func @dueling_dqn_kernel(%arg0: i32, %arg1: memref<8x256xf32, #tpu.memory_space<vmem>>, %arg2: memref<256x896xf32, #tpu.memory_space<vmem>>, %arg3: memref<1x896xf32, #tpu.memory_space<vmem>>, %arg4: memref<8x128xf32, #tpu.memory_space<vmem>>) attributes {dimension_semantics = [#tpu.dimension_semantics<parallel>], iteration_bounds = array<i64: 1>, scalar_prefetch = 0 : i64, scratch_operands = 0 : i64, tpu.core_type = #tpu.core_type<tc>, window_params = [{transform_indices = @transform_0, window_bounds = array<i64: 8, 256>}, {pipeline_mode = #tpu.pipeline_mode<synchronous>, transform_indices = @transform_1, window_bounds = array<i64: 256, 896>}, {pipeline_mode = #tpu.pipeline_mode<synchronous>, transform_indices = @transform_2, window_bounds = array<i64: 1, 896>}, {transform_indices = @transform_3, window_bounds = array<i64: 8, 128>}]} {
    %c0 = arith.constant 0 : index
    %c0_0 = arith.constant 0 : index
    %0 = vector.load %arg1[%c0, %c0_0] : memref<8x256xf32, #tpu.memory_space<vmem>>, vector<8x256xf32>
    %c0_1 = arith.constant 0 : index
    %c0_2 = arith.constant 0 : index
    %1 = vector.load %arg2[%c0_1, %c0_2] : memref<256x896xf32, #tpu.memory_space<vmem>>, vector<256x256xf32>
    %cst = arith.constant dense<0.000000e+00> : vector<8x256xf32>
    %2 = tpu.matmul %0, %1, %cst {dimension_numbers = #tpu.dot_dimension_numbers<[1], [0], [0], [1], [0, 0, 1, 1], [], []>} : vector<8x256xf32>, vector<256x256xf32>, vector<8x256xf32> -> vector<8x256xf32>
    %c0_3 = arith.constant 0 : index
    %c0_4 = arith.constant 0 : index
    %3 = vector.load %arg3[%c0_3, %c0_4] : memref<1x896xf32, #tpu.memory_space<vmem>>, vector<1x256xf32>
    %4 = vector.broadcast %3 : vector<1x256xf32> to vector<8x256xf32>
    %5 = arith.addf %2, %4 : vector<8x256xf32>
    %cst_5 = arith.constant 0.000000e+00 : f32
    %6 = vector.broadcast %cst_5 : f32 to vector<8x256xf32>
    %7 = arith.maximumf %5, %6 : vector<8x256xf32>
    %c0_6 = arith.constant 0 : index
    %c256 = arith.constant 256 : index
    %8 = vector.load %arg2[%c0_6, %c256] : memref<256x896xf32, #tpu.memory_space<vmem>>, vector<256x256xf32>
    %cst_7 = arith.constant dense<0.000000e+00> : vector<8x256xf32>
    %9 = tpu.matmul %7, %8, %cst_7 {dimension_numbers = #tpu.dot_dimension_numbers<[1], [0], [0], [1], [0, 0, 1, 1], [], []>} : vector<8x256xf32>, vector<256x256xf32>, vector<8x256xf32> -> vector<8x256xf32>
    %c0_8 = arith.constant 0 : index
    %c256_9 = arith.constant 256 : index
    %10 = vector.load %arg3[%c0_8, %c256_9] : memref<1x896xf32, #tpu.memory_space<vmem>>, vector<1x256xf32>
    %11 = vector.broadcast %10 : vector<1x256xf32> to vector<8x256xf32>
    %12 = arith.addf %9, %11 : vector<8x256xf32>
    %cst_10 = arith.constant 0.000000e+00 : f32
    %13 = vector.broadcast %cst_10 : f32 to vector<8x256xf32>
    %14 = arith.maximumf %12, %13 : vector<8x256xf32>
    %c0_11 = arith.constant 0 : index
    %c512 = arith.constant 512 : index
    %15 = vector.load %arg2[%c0_11, %c512] : memref<256x896xf32, #tpu.memory_space<vmem>>, vector<256x256xf32>
    %cst_12 = arith.constant dense<0.000000e+00> : vector<8x256xf32>
    %16 = tpu.matmul %14, %15, %cst_12 {dimension_numbers = #tpu.dot_dimension_numbers<[1], [0], [0], [1], [0, 0, 1, 1], [], []>} : vector<8x256xf32>, vector<256x256xf32>, vector<8x256xf32> -> vector<8x256xf32>
    %c0_13 = arith.constant 0 : index
    %c512_14 = arith.constant 512 : index
    %17 = vector.load %arg3[%c0_13, %c512_14] : memref<1x896xf32, #tpu.memory_space<vmem>>, vector<1x256xf32>
    %18 = vector.broadcast %17 : vector<1x256xf32> to vector<8x256xf32>
    %19 = arith.addf %16, %18 : vector<8x256xf32>
    %cst_15 = arith.constant 0.000000e+00 : f32
    %20 = vector.broadcast %cst_15 : f32 to vector<8x256xf32>
    %21 = arith.maximumf %19, %20 : vector<8x256xf32>
    %c0_16 = arith.constant 0 : index
    %c768 = arith.constant 768 : index
    %22 = vector.load %arg2[%c0_16, %c768] : memref<256x896xf32, #tpu.memory_space<vmem>>, vector<256x128xf32>
    %cst_17 = arith.constant dense<0.000000e+00> : vector<8x128xf32>
    %23 = tpu.matmul %21, %22, %cst_17 {dimension_numbers = #tpu.dot_dimension_numbers<[1], [0], [0], [1], [0, 0, 1, 1], [], []>} : vector<8x256xf32>, vector<256x128xf32>, vector<8x128xf32> -> vector<8x128xf32>
    %c0_18 = arith.constant 0 : index
    %c768_19 = arith.constant 768 : index
    %24 = vector.load %arg3[%c0_18, %c768_19] : memref<1x896xf32, #tpu.memory_space<vmem>>, vector<1x128xf32>
    %25 = vector.broadcast %24 : vector<1x128xf32> to vector<8x128xf32>
    %26 = arith.addf %23, %25 : vector<8x128xf32>
    %c0_20 = arith.constant 0 : index
    %c0_21 = arith.constant 0 : index
    %27 = vector.load %arg4[%c0_20, %c0_21] : memref<8x128xf32, #tpu.memory_space<vmem>>, vector<8x128xf32>
    tpu.vector_store %arg4[%c0_20, %c0_21], %26 {strides = array<i32>} : memref<8x128xf32, #tpu.memory_space<vmem>>, vector<8x128xf32>,
    return
  }
  func.func @transform_0(%arg0: i32) -> (i32, i32) {
    %c0_i32 = arith.constant 0 : i32
    %c0_i32_0 = arith.constant 0 : i32
    return %arg0, %c0_i32 : i32, i32
  }
  func.func @transform_1(%arg0: i32) -> (i32, i32) {
    %c0_i32 = arith.constant 0 : i32
    %c0_i32_0 = arith.constant 0 : i32
    %c0_i32_1 = arith.constant 0 : i32
    return %c0_i32, %c0_i32_0 : i32, i32
  }
  func.func @transform_2(%arg0: i32) -> (i32, i32) {
    %c0_i32 = arith.constant 0 : i32
    %c0_i32_0 = arith.constant 0 : i32
    %c0_i32_1 = arith.constant 0 : i32
    return %c0_i32, %c0_i32_0 : i32, i32
  }
  func.func @transform_3(%arg0: i32) -> (i32, i32) {
    %c0_i32 = arith.constant 0 : i32
    %c0_i32_0 = arith.constant 0 : i32
    return %arg0, %c0_i32 : i32, i32
  }
}

</mosaic_0001>

<bundles_post_ra>
// kernel: dueling_dqn_forward.1
= control target key start
LH: loop header
LB: loop body
LE: loop exit
PB: predicated region body
PF: predicated region fallthrough
CT: control target
= control target key end

     0   :  { %8 = vsyncpa [#allocation3], 0  ;;  %s653_s12 = smov [#allocation2]   ;;  %s710_s0 = inlined_call_operand.vmem [shape: f32[8,256], index: 0, kind: input, shape index: {}]   ;;  %s711_s1 = inlined_call_operand.hbm [shape: f32[256,896], index: 1, kind: input, shape index: {}]   ;;  %s712_s2 = inlined_call_operand.vmem [shape: f32[1,896], index: 2, kind: input, shape index: {}]   ;;  %s713_s3 = inlined_call_operand.vmem [shape: f32[8,128], index: 3, kind: output, shape index: {}]  }
   0x1   :  { %s16_s13 = sshll.u32 %s653_s12, 4  ;;  %s17_s13 = int_to_ptr.vmem [resolvable:$true] %s16_s13 }
   0x2   :  { %s639_s14 = scalar_lea.vmem %s17_s13, 28672  ;;  %p644_p1 = scmp.lt.s32.totalorder %s17_s13, %s17_s13 }
   0x3   :  { %p640_p0 = scmp.ne.s32.totalorder %s17_s13, %s639_s14  ;;  %p645_p2 = scmp.lt.s32.totalorder %s639_s14, %s639_s14 }
   0x5   :  { %p646_p3 = por %p645_p2, %p644_p1 }
   0x7   :  { %p647_p4 = pnand %p646_p3, %p640_p0 }
   0x9   :  { %650 = shalt.err (!%p647_p4)
}
   0xa   :  { %s654_s15 = smov 896   ;;  %s655_s16 = smov 56  }
   0xb   :  { %22 = dma.hbm_to_vmem [thread:$0]  %s711_s1, 28672, %s17_s13, [#allocation3], %s654_s15, %s654_s15, %s655_s16  }
   0xc   :  { %651 = dma.done.wait [#allocation3], 28672  }
   0xd   :  { %652 = vsyncadd [#allocation3], 4294938624  ;;  %v61_v0 = vld [vmem:[#allocation2 + $0x350] sm:$0xff]  ;;  %v60_v1 = vld [vmem:[#allocation2 + $0x348] sm:$0xff] }
   0xe   :  { %v59_v2 = vld [vmem:[#allocation2 + $0x318] sm:$0xff]  ;;  %106 = vmatprep.subr.mxu0 %v61_v0  ;;  %v58_v3 = vld [vmem:[#allocation2 + $0x310] sm:$0xff]  ;;  %v57_v4 = vld [vmem:[#allocation2 + $0x2e0] sm:$0xff] }
   0xf   :  { %107 = vmatpush1.msra.mxu0 %v60_v1  ;;  %v56_v5 = vld [vmem:[#allocation2 + $0x2d8] sm:$0xff]  ;;  %v55_v6 = vld [vmem:[#allocation2 + $0x2a8] sm:$0xff]  ;;  %v54_v7 = vld [vmem:[#allocation2 + $0x2a0] sm:$0xff] }
  0x10   :  { %108 = vmatprep.subr.mxu0 %v59_v2  ;;  %v53_v8 = vld [vmem:[#allocation2 + $0x270] sm:$0xff]  ;;  %v52_v9 = vld [vmem:[#allocation2 + $0x268] sm:$0xff]  ;;  %v51_v10 = vld [vmem:[#allocation2 + $0x238] sm:$0xff] }
  0x11   :  { %109 = vmatpush1.msra.mxu0 %v58_v3  ;;  %v50_v11 = vld [vmem:[#allocation2 + $0x230] sm:$0xff]  ;;  %v49_v12 = vld [vmem:[#allocation2 + $0x200] sm:$0xff]  ;;  %v48_v13 = vld [vmem:[#allocation2 + $0x1f8] sm:$0xff] }
  0x12   :  { %110 = vmatprep.subr.mxu0 %v57_v4  ;;  %v47_v14 = vld [vmem:[#allocation2 + $0x1c8] sm:$0xff]  ;;  %v46_v15 = vld [vmem:[#allocation2 + $0x1c0] sm:$0xff]  ;;  %v45_v16 = vld [vmem:[#allocation2 + $0x190] sm:$0xff] }
  0x13   :  { %111 = vmatpush1.msra.mxu0 %v56_v5  ;;  %v44_v17 = vld [vmem:[#allocation2 + $0x188] sm:$0xff]  ;;  %v43_v18 = vld [vmem:[#allocation2 + $0x158] sm:$0xff]  ;;  %v42_v19 = vld [vmem:[#allocation2 + $0x150] sm:$0xff] }
  0x14   :  { %112 = vmatprep.subr.mxu0 %v55_v6  ;;  %v41_v20 = vld [vmem:[#allocation2 + $0x120] sm:$0xff]  ;;  %v40_v21 = vld [vmem:[#allocation2 + $0x118] sm:$0xff]  ;;  %v39_v22 = vld [vmem:[#allocation2 + $0xe8] sm:$0xff] }
  0x15   :  { %113 = vmatpush1.msra.mxu0 %v54_v7  ;;  %v38_v23 = vld [vmem:[#allocation2 + $0xe0] sm:$0xff]  ;;  %v37_v24 = vld [vmem:[#allocation2 + $0xb0] sm:$0xff]  ;;  %v29_v25 = vld [vmem:[%s710_s0 + $0x8] sm:$0xff] }
  0x16   :  { %114 = vmatprep.subr.mxu0 %v53_v8  ;;  %170 = vmatprep.mubr.f32.mxu0 %v29_v25  ;;  %v210_v26 = vld [vmem:[#allocation2 + $0x360] sm:$0xff]  ;;  %v209_v27 = vld [vmem:[#allocation2 + $0x358] sm:$0xff]  ;;  %v208_v28 = vld [vmem:[#allocation2 + $0x328] sm:$0xff] }
  0x17   :  { %115 = vmatpush1.msra.mxu0 %v52_v9  ;;  %v36_v29 = vld [vmem:[#allocation2 + $0xa8] sm:$0xff]  ;;  %255 = vmatprep.subr.mxu1 %v210_v26  ;;  %v207_v30 = vld [vmem:[#allocation2 + $0x320] sm:$0xff]  ;;  %v35_v31 = vld [vmem:[#allocation2 + $0x78] sm:$0xff] }
  0x18   :  { %116 = vmatprep.subr.mxu0 %v51_v10  ;;  %256 = vmatpush1.msra.mxu1 %v209_v27  ;;  %v206_v32 = vld [vmem:[#allocation2 + $0x2f0] sm:$0xff]  ;;  %v205_v34 = vld [vmem:[#allocation2 + $0x2e8] sm:$0xff]  ;;  %v33_v35 = vld [vmem:[#allocation2 + $0x40] sm:$0xff] }
  0x19   :  { %117 = vmatpush1.msra.mxu0 %v50_v11  ;;  %v34_v33 = vld [vmem:[#allocation2 + $0x70] sm:$0xff]  ;;  %257 = vmatprep.subr.mxu1 %v208_v28  ;;  %v204_v36 = vld [vmem:[#allocation2 + $0x2b8] sm:$0xff]  ;;  %v31_v39 = vld [vmem:[#allocation2 + $0x8] sm:$0xff] }
  0x1a   :  { %118 = vmatprep.subr.mxu0 %v49_v12  ;;  %258 = vmatpush1.msra.mxu1 %v207_v30  ;;  %v32_v37 = vld [vmem:[#allocation2 + $0x38] sm:$0xff]  ;;  %v203_v38 = vld [vmem:[#allocation2 + $0x2b0] sm:$0xff]  ;;  %v202_v40 = vld [vmem:[#allocation2 + $0x280] sm:$0xff] }
  0x1b   :  { %119 = vmatpush1.msra.mxu0 %v48_v13  ;;  %259 = vmatprep.subr.mxu1 %v206_v32  ;;  %v30_v41 = vld [vmem:[#allocation2] sm:$0xff]  ;;  %v201_v42 = vld [vmem:[#allocation2 + $0x278] sm:$0xff]  ;;  %v93_v43 = vld [vmem:[#allocation2 + $0x6d0] sm:$0xff] }
  0x1c   :  { %120 = vmatprep.subr.mxu0 %v47_v14  ;;  %260 = vmatpush1.msra.mxu1 %v205_v34  ;;  %v200_v44 = vld [vmem:[#allocation2 + $0x248] sm:$0xff]  ;;  %v199_v46 = vld [vmem:[#allocation2 + $0x240] sm:$0xff]  ;;  %v91_v47 = vld [vmem:[#allocation2 + $0x698] sm:$0xff] }
  0x1d   :  { %121 = vmatpush1.msra.mxu0 %v46_v15  ;;  %261 = vmatprep.subr.mxu1 %v204_v36  ;;  %v92_v45 = vld [vmem:[#allocation2 + $0x6c8] sm:$0xff]  ;;  %v198_v48 = vld [vmem:[#allocation2 + $0x210] sm:$0xff]  ;;  %v89_v51 = vld [vmem:[#allocation2 + $0x660] sm:$0xff] }
  0x1e   :  { %122 = vmatprep.subr.mxu0 %v45_v16  ;;  %262 = vmatpush1.msra.mxu1 %v203_v38  ;;  %v90_v49 = vld [vmem:[#allocation2 + $0x690] sm:$0xff]  ;;  %v197_v50 = vld [vmem:[#allocation2 + $0x208] sm:$0xff]  ;;  %v196_v52 = vld [vmem:[#allocation2 + $0x1d8] sm:$0xff] }
  0x1f   :  { %123 = vmatpush1.msra.mxu0 %v44_v17  ;;  %263 = vmatprep.subr.mxu1 %v202_v40  ;;  %v88_v53 = vld [vmem:[#allocation2 + $0x658] sm:$0xff]  ;;  %v195_v54 = vld [vmem:[#allocation2 + $0x1d0] sm:$0xff]  ;;  %v87_v55 = vld [vmem:[#allocation2 + $0x628] sm:$0xff] }
  0x20   :  { %124 = vmatprep.subr.mxu0 %v43_v18  ;;  %264 = vmatpush1.msra.mxu1 %v201_v42  ;;  %v194_v56 = vld [vmem:[#allocation2 + $0x1a0] sm:$0xff]  ;;  %v193_v58 = vld [vmem:[#allocation2 + $0x198] sm:$0xff]  ;;  %v85_v59 = vld [vmem:[#allocation2 + $0x5f0] sm:$0xff] }
  0x21   :  { %125 = vmatpush1.msra.mxu0 %v42_v19  ;;  %265 = vmatprep.subr.mxu1 %v200_v44  ;;  %v86_v57 = vld [vmem:[#allocation2 + $0x620] sm:$0xff]  ;;  %v192_v60 = vld [vmem:[#allocation2 + $0x168] sm:$0xff]  ;;  %v83_v63 = vld [vmem:[#allocation2 + $0x5b8] sm:$0xff] }
  0x22   :  { %126 = vmatprep.subr.mxu0 %v41_v20  ;;  %266 = vmatpush1.msra.mxu1 %v199_v46  ;;  %v84_v61 = vld [vmem:[#allocation2 + $0x5e8] sm:$0xff]  ;;  %v191_v62 = vld [vmem:[#allocation2 + $0x160] sm:$0xff]  ;;  %v190_v0 = vld [vmem:[#allocation2 + $0x130] sm:$0xff] }
  0x23   :  { %127 = vmatpush1.msra.mxu0 %v40_v21  ;;  %267 = vmatprep.subr.mxu1 %v198_v48  ;;  %v82_v1 = vld [vmem:[#allocation2 + $0x5b0] sm:$0xff]  ;;  %v189_v2 = vld [vmem:[#allocation2 + $0x128] sm:$0xff]  ;;  %v81_v3 = vld [vmem:[#allocation2 + $0x580] sm:$0xff] }
  0x24   :  { %128 = vmatprep.subr.mxu0 %v39_v22  ;;  %268 = vmatpush1.msra.mxu1 %v197_v50  ;;  %v188_v4 = vld [vmem:[#allocation2 + $0xf8] sm:$0xff]  ;;  %v187_v6 = vld [vmem:[#allocation2 + $0xf0] sm:$0xff]  ;;  %v79_v7 = vld [vmem:[#allocation2 + $0x548] sm:$0xff] }
  0x25   :  { %129 = vmatpush1.msra.mxu0 %v38_v23  ;;  %269 = vmatprep.subr.mxu1 %v196_v52  ;;  %v80_v5 = vld [vmem:[#allocation2 + $0x578] sm:$0xff]  ;;  %v186_v8 = vld [vmem:[#allocation2 + $0xc0] sm:$0xff]  ;;  %v77_v11 = vld [vmem:[#allocation2 + $0x510] sm:$0xff] }
  0x26   :  { %130 = vmatprep.subr.mxu0 %v37_v24  ;;  %270 = vmatpush1.msra.mxu1 %v195_v54  ;;  %v78_v9 = vld [vmem:[#allocation2 + $0x540] sm:$0xff]  ;;  %v185_v10 = vld [vmem:[#allocation2 + $0xb8] sm:$0xff]  ;;  %v184_v12 = vld [vmem:[#allocation2 + $0x88] sm:$0xff] }
  0x27   :  { %131 = vmatpush1.msra.mxu0 %v36_v29  ;;  %271 = vmatprep.subr.mxu1 %v194_v56  ;;  %v76_v13 = vld [vmem:[#allocation2 + $0x508] sm:$0xff]  ;;  %v183_v14 = vld [vmem:[#allocation2 + $0x80] sm:$0xff]  ;;  %v75_v15 = vld [vmem:[#allocation2 + $0x4d8] sm:$0xff] }
  0x28   :  { %132 = vmatprep.subr.mxu0 %v35_v31  ;;  %272 = vmatpush1.msra.mxu1 %v193_v58  ;;  %v182_v16 = vld [vmem:[#allocation2 + $0x50] sm:$0xff]  ;;  %v181_v18 = vld [vmem:[#allocation2 + $0x48] sm:$0xff]  ;;  %v73_v19 = vld [vmem:[#allocation2 + $0x4a0] sm:$0xff] }
  0x29   :  { %133 = vmatpush1.msra.mxu0 %v34_v33  ;;  %273 = vmatprep.subr.mxu1 %v192_v60  ;;  %v74_v17 = vld [vmem:[#allocation2 + $0x4d0] sm:$0xff]  ;;  %v180_v20 = vld [vmem:[#allocation2 + $0x18] sm:$0xff]  ;;  %v71_v23 = vld [vmem:[#allocation2 + $0x468] sm:$0xff] }
  0x2a   :  { %134 = vmatprep.subr.mxu0 %v33_v35  ;;  %274 = vmatpush1.msra.mxu1 %v191_v62  ;;  %v72_v21 = vld [vmem:[#allocation2 + $0x498] sm:$0xff]  ;;  %v179_v22 = vld [vmem:[#allocation2 + $0x10] sm:$0xff]  ;;  %v242_v24 = vld [vmem:[#allocation2 + $0x6e0] sm:$0xff] }
  0x2b   :  { %135 = vmatpush1.msra.mxu0 %v32_v37  ;;  %275 = vmatprep.subr.mxu1 %v190_v0  ;;  %v70_v25 = vld [vmem:[#allocation2 + $0x460] sm:$0xff]  ;;  %v241_v26 = vld [vmem:[#allocation2 + $0x6d8] sm:$0xff]  ;;  %v69_v27 = vld [vmem:[#allocation2 + $0x430] sm:$0xff] }
  0x2c   :  { %136 = vmatprep.subr.mxu0 %v31_v39  ;;  %276 = vmatpush1.msra.mxu1 %v189_v2  ;;  %v240_v28 = vld [vmem:[#allocation2 + $0x6a8] sm:$0xff]  ;;  %v239_v30 = vld [vmem:[#allocation2 + $0x6a0] sm:$0xff]  ;;  %v67_v31 = vld [vmem:[#allocation2 + $0x3f8] sm:$0xff] }
  0x2d   :  { %137 = vmatpush1.msra.mxu0 %v30_v41  ;;  %277 = vmatprep.subr.mxu1 %v188_v4  ;;  %v68_v29 = vld [vmem:[#allocation2 + $0x428] sm:$0xff]  ;;  %v238_v32 = vld [vmem:[#allocation2 + $0x670] sm:$0xff]  ;;  %v65_v35 = vld [vmem:[#allocation2 + $0x3c0] sm:$0xff] }
  0x2e   :  { %138 = vmatprep.subr.mxu0 %v93_v43  ;;  %278 = vmatpush1.msra.mxu1 %v187_v6  ;;  %v66_v33 = vld [vmem:[#allocation2 + $0x3f0] sm:$0xff]  ;;  %v237_v34 = vld [vmem:[#allocation2 + $0x668] sm:$0xff]  ;;  %v236_v36 = vld [vmem:[#allocation2 + $0x638] sm:$0xff] }
  0x2f   :  { %139 = vmatpush2.msra.mxu0 %v92_v45  ;;  %279 = vmatprep.subr.mxu1 %v186_v8  ;;  %v64_v37 = vld [vmem:[#allocation2 + $0x3b8] sm:$0xff]  ;;  %v235_v38 = vld [vmem:[#allocation2 + $0x630] sm:$0xff]  ;;  %v63_v39 = vld [vmem:[#allocation2 + $0x388] sm:$0xff] }
  0x30   :  { %140 = vmatprep.subr.mxu0 %v91_v47  ;;  %280 = vmatpush1.msra.mxu1 %v185_v10  ;;  %v234_v40 = vld [vmem:[#allocation2 + $0x600] sm:$0xff]  ;;  %v233_v42 = vld [vmem:[#allocation2 + $0x5f8] sm:$0xff]  ;;  %v232_v44 = vld [vmem:[#allocation2 + $0x5c8] sm:$0xff] }
  0x31   :  { %141 = vmatpush2.msra.mxu0 %v90_v49  ;;  %281 = vmatprep.subr.mxu1 %v184_v12  ;;  %v62_v41 = vld [vmem:[#allocation2 + $0x380] sm:$0xff]  ;;  %v230_v46 = vld [vmem:[#allocation2 + $0x590] sm:$0xff]  ;;  %v229_v47 = vld [vmem:[#allocation2 + $0x588] sm:$0xff] }
  0x32   :  { %142 = vmatprep.subr.mxu0 %v89_v51  ;;  %282 = vmatpush1.msra.mxu1 %v183_v14  ;;  %v28_v43 = vld [vmem:[%s710_s0] sm:$0xff]  ;;  %v228_v48 = vld [vmem:[#allocation2 + $0x558] sm:$0xff]  ;;  %v227_v49 = vld [vmem:[#allocation2 + $0x550] sm:$0xff] }
  0x33   :  { %143 = vmatpush2.msra.mxu0 %v88_v53  ;;  %283 = vmatprep.subr.mxu1 %v182_v16  ;;  %v231_v45 = vld [vmem:[#allocation2 + $0x5c0] sm:$0xff]  ;;  %v225_v51 = vld [vmem:[#allocation2 + $0x518] sm:$0xff]  ;;  %v224_v52 = vld [vmem:[#allocation2 + $0x4e8] sm:$0xff] }
  0x34   :  { %144 = vmatprep.subr.mxu0 %v87_v55  ;;  %284 = vmatpush1.msra.mxu1 %v181_v18  ;;  %v226_v50 = vld [vmem:[#allocation2 + $0x520] sm:$0xff]  ;;  %v222_v54 = vld [vmem:[#allocation2 + $0x4b0] sm:$0xff]  ;;  %v221_v55 = vld [vmem:[#allocation2 + $0x4a8] sm:$0xff] }
  0x35   :  { %145 = vmatpush2.msra.mxu0 %v86_v57  ;;  %285 = vmatprep.subr.mxu1 %v180_v20  ;;  %v223_v53 = vld [vmem:[#allocation2 + $0x4e0] sm:$0xff]  ;;  %v220_v56 = vld [vmem:[#allocation2 + $0x478] sm:$0xff]  ;;  %v219_v57 = vld [vmem:[#allocation2 + $0x470] sm:$0xff] }
  0x36   :  { %146 = vmatprep.subr.mxu0 %v85_v59  ;;  %286 = vmatpush1.msra.mxu1 %v179_v22  ;;  %v218_v58 = vld [vmem:[#allocation2 + $0x440] sm:$0xff]  ;;  %v217_v59 = vld [vmem:[#allocation2 + $0x438] sm:$0xff]  ;;  %v216_v60 = vld [vmem:[#allocation2 + $0x408] sm:$0xff] }
  0x37   :  { %147 = vmatpush2.msra.mxu0 %v84_v61  ;;  %287 = vmatprep.subr.mxu1 %v242_v24  ;;  %v215_v61 = vld [vmem:[#allocation2 + $0x400] sm:$0xff]  ;;  %v214_v62 = vld [vmem:[#allocation2 + $0x3d0] sm:$0xff]  ;;  %v212_v0 = vld [vmem:[#allocation2 + $0x398] sm:$0xff] }
  0x38   :  { %148 = vmatprep.subr.mxu0 %v83_v63  ;;  %288 = vmatpush2.msra.mxu1 %v241_v26  ;;  %v213_v63 = vld [vmem:[#allocation2 + $0x3c8] sm:$0xff]  ;;  %v359_v2 = vld [vmem:[#allocation2 + $0x370] sm:$0xff]  ;;  %v357_v4 = vld [vmem:[#allocation2 + $0x338] sm:$0xff] }
  0x39   :  { %149 = vmatpush2.msra.mxu0 %v82_v1  ;;  %289 = vmatprep.subr.mxu1 %v240_v28  ;;  %v211_v1 = vld [vmem:[#allocation2 + $0x390] sm:$0xff]  ;;  %v355_v6 = vld [vmem:[#allocation2 + $0x300] sm:$0xff]  ;;  %v353_v8 = vld [vmem:[#allocation2 + $0x2c8] sm:$0xff] }
  0x3a   :  { %150 = vmatprep.subr.mxu0 %v81_v3  ;;  %290 = vmatpush2.msra.mxu1 %v239_v30  ;;  %v358_v3 = vld [vmem:[#allocation2 + $0x368] sm:$0xff]  ;;  %v351_v10 = vld [vmem:[#allocation2 + $0x290] sm:$0xff]  ;;  %v349_v12 = vld [vmem:[#allocation2 + $0x258] sm:$0xff] }
  0x3b   :  { %151 = vmatpush2.msra.mxu0 %v80_v5  ;;  %291 = vmatprep.subr.mxu1 %v238_v32  ;;  %v356_v5 = vld [vmem:[#allocation2 + $0x330] sm:$0xff]  ;;  %v347_v14 = vld [vmem:[#allocation2 + $0x220] sm:$0xff]  ;;  %v345_v16 = vld [vmem:[#allocation2 + $0x1e8] sm:$0xff] }
  0x3c   :  { %152 = vmatprep.subr.mxu0 %v79_v7  ;;  %292 = vmatpush2.msra.mxu1 %v237_v34  ;;  %v354_v7 = vld [vmem:[#allocation2 + $0x2f8] sm:$0xff]  ;;  %v343_v18 = vld [vmem:[#allocation2 + $0x1b0] sm:$0xff]  ;;  %v339_v22 = vld [vmem:[#allocation2 + $0x140] sm:$0xff] }
  0x3d   :  { %153 = vmatpush2.msra.mxu0 %v78_v9  ;;  %293 = vmatprep.subr.mxu1 %v236_v36  ;;  %v352_v9 = vld [vmem:[#allocation2 + $0x2c0] sm:$0xff]  ;;  %v341_v20 = vld [vmem:[#allocation2 + $0x178] sm:$0xff]  ;;  %v337_v24 = vld [vmem:[#allocation2 + $0x108] sm:$0xff] }
  0x3e   :  { %154 = vmatprep.subr.mxu0 %v77_v11  ;;  %294 = vmatpush2.msra.mxu1 %v235_v38  ;;  %v350_v11 = vld [vmem:[#allocation2 + $0x288] sm:$0xff]  ;;  %v335_v26 = vld [vmem:[#allocation2 + $0xd0] sm:$0xff]  ;;  %v333_v28 = vld [vmem:[#allocation2 + $0x98] sm:$0xff] }
  0x3f   :  { %155 = vmatpush2.msra.mxu0 %v76_v13  ;;  %295 = vmatprep.subr.mxu1 %v234_v40  ;;  %v348_v13 = vld [vmem:[#allocation2 + $0x250] sm:$0xff]  ;;  %v331_v30 = vld [vmem:[#allocation2 + $0x60] sm:$0xff]  ;;  %v329_v32 = vld [vmem:[#allocation2 + $0x28] sm:$0xff] }
  0x40   :  { %156 = vmatprep.subr.mxu0 %v75_v15  ;;  %296 = vmatpush2.msra.mxu1 %v233_v42  ;;  %v346_v15 = vld [vmem:[#allocation2 + $0x218] sm:$0xff]  ;;  %v391_v34 = vld [vmem:[#allocation2 + $0x6f0] sm:$0xff]  ;;  %v387_v38 = vld [vmem:[#allocation2 + $0x680] sm:$0xff] }
  0x41   :  { %157 = vmatpush2.msra.mxu0 %v74_v17  ;;  %297 = vmatprep.subr.mxu1 %v232_v44  ;;  %v344_v17 = vld [vmem:[#allocation2 + $0x1e0] sm:$0xff]  ;;  %v389_v36 = vld [vmem:[#allocation2 + $0x6b8] sm:$0xff]  ;;  %v385_v40 = vld [vmem:[#allocation2 + $0x648] sm:$0xff] }
  0x42   :  { %158 = vmatprep.subr.mxu0 %v73_v19  ;;  %298 = vmatpush2.msra.mxu1 %v231_v45  ;;  %v342_v19 = vld [vmem:[#allocation2 + $0x1a8] sm:$0xff]  ;;  %v383_v42 = vld [vmem:[#allocation2 + $0x610] sm:$0xff]  ;;  %v381_v44 = vld [vmem:[#allocation2 + $0x5d8] sm:$0xff] }
  0x43   :  { %159 = vmatpush2.msra.mxu0 %v72_v21  ;;  %299 = vmatprep.subr.mxu1 %v230_v46  ;;  %v340_v21 = vld [vmem:[#allocation2 + $0x170] sm:$0xff]  ;;  %v379_v46 = vld [vmem:[#allocation2 + $0x5a0] sm:$0xff] }
  0x44   :  { %160 = vmatprep.subr.mxu0 %v71_v23  ;;  %300 = vmatpush2.msra.mxu1 %v229_v47  ;;  %v338_v23 = vld [vmem:[#allocation2 + $0x138] sm:$0xff]  ;;  %v380_v45 = vld [vmem:[#allocation2 + $0x5d0] sm:$0xff] }
  0x45   :  { %161 = vmatpush2.msra.mxu0 %v70_v25  ;;  %301 = vmatprep.subr.mxu1 %v228_v48  ;;  %v336_v25 = vld [vmem:[#allocation2 + $0x100] sm:$0xff]  ;;  %v378_v47 = vld [vmem:[#allocation2 + $0x598] sm:$0xff]  ;;  %v377_v48 = vld [vmem:[#allocation2 + $0x568] sm:$0xff] }
  0x46   :  { %162 = vmatprep.subr.mxu0 %v69_v27  ;;  %302 = vmatpush2.msra.mxu1 %v227_v49  ;;  %v334_v27 = vld [vmem:[#allocation2 + $0xc8] sm:$0xff]  ;;  %v376_v49 = vld [vmem:[#allocation2 + $0x560] sm:$0xff] }
  0x47   :  { %163 = vmatpush2.msra.mxu0 %v68_v29  ;;  %303 = vmatprep.subr.mxu1 %v226_v50  ;;  %v332_v29 = vld [vmem:[#allocation2 + $0x90] sm:$0xff] }
  0x48   :  { %164 = vmatprep.subr.mxu0 %v67_v31  ;;  %304 = vmatpush2.msra.mxu1 %v225_v51  ;;  %v330_v31 = vld [vmem:[#allocation2 + $0x58] sm:$0xff]  ;;  %v375_v50 = vld [vmem:[#allocation2 + $0x530] sm:$0xff]  ;;  %v374_v51 = vld [vmem:[#allocation2 + $0x528] sm:$0xff] }
  0x49   :  { %165 = vmatpush2.msra.mxu0 %v66_v33  ;;  %305 = vmatprep.subr.mxu1 %v224_v52  ;;  %v328_v33 = vld [vmem:[#allocation2 + $0x20] sm:$0xff]  ;;  %v373_v52 = vld [vmem:[#allocation2 + $0x4f8] sm:$0xff] }
  0x4a   :  { %166 = vmatprep.subr.mxu0 %v65_v35  ;;  %306 = vmatpush2.msra.mxu1 %v223_v53  ;;  %v390_v35 = vld [vmem:[#allocation2 + $0x6e8] sm:$0xff]  ;;  %v372_v53 = vld [vmem:[#allocation2 + $0x4f0] sm:$0xff] }
  0x4b   :  { %167 = vmatpush2.msra.mxu0 %v64_v37  ;;  %307 = vmatprep.subr.mxu1 %v222_v54  ;;  %v388_v37 = vld [vmem:[#allocation2 + $0x6b0] sm:$0xff]  ;;  %v371_v54 = vld [vmem:[#allocation2 + $0x4c0] sm:$0xff] }
  0x4c   :  { %168 = vmatprep.subr.mxu0 %v63_v39  ;;  %308 = vmatpush2.msra.mxu1 %v221_v55  ;;  %v386_v39 = vld [vmem:[#allocation2 + $0x678] sm:$0xff] }
  0x4d   :  { %169 = vmatpush2.msra.mxu0 %v62_v41  ;;  %309 = vmatprep.subr.mxu1 %v220_v56  ;;  %v384_v41 = vld [vmem:[#allocation2 + $0x640] sm:$0xff]  ;;  %v370_v55 = vld [vmem:[#allocation2 + $0x4b8] sm:$0xff]  ;;  %v369_v56 = vld [vmem:[#allocation2 + $0x488] sm:$0xff] }
  0x4e   :  { %171 = vmatmul.mubr.f32.vlgmr.msra.gmra.mxu0 %v28_v43  ;;  %310 = vmatpush2.msra.mxu1 %v219_v57  ;;  %v382_v43 = vld [vmem:[#allocation2 + $0x608] sm:$0xff]  ;;  %v368_v57 = vld [vmem:[#allocation2 + $0x480] sm:$0xff] }
  0x4f   :  { %311 = vmatprep.subr.mxu1 %v218_v58  ;;  %404 = vmatprep.subr.mxu0 %v359_v2  ;;  %v96_v58 = vlaneseq }
  0x50   :  { %312 = vmatpush2.msra.mxu1 %v217_v59  ;;  %405 = vmatpush1.msra.mxu0 %v358_v3 }
  0x51   :  { %313 = vmatprep.subr.mxu1 %v216_v60  ;;  %406 = vmatprep.subr.mxu0 %v357_v4  ;;  %v97_v59 = vshrl.u32 %v96_v58, 7 }
  0x52   :  { %314 = vmatpush2.msra.mxu1 %v215_v61  ;;  %407 = vmatpush1.msra.mxu0 %v356_v5  ;;  %v94_v61 = vld [vmem:[%s712_s2] sm:$0x3] }
  0x53   :  { %315 = vmatprep.subr.mxu1 %v214_v62  ;;  %408 = vmatprep.subr.mxu0 %v355_v6  ;;  %v685_v60 = vsub.s32 0, %v97_v59  ;;  %v690_v62 = vsub.s32 1, %v97_v59 }
  0x54   :  { %316 = vmatpush2.msra.mxu1 %v213_v63  ;;  %409 = vmatpush1.msra.mxu0 %v354_v7  ;;  %v367_v7 = vld [vmem:[#allocation2 + $0x450] sm:$0xff] }
  0x55   :  { %317 = vmatprep.subr.mxu1 %v212_v0  ;;  %410 = vmatprep.subr.mxu0 %v353_v8  ;;  %v99_v63 = vrot.slane %v94_v61, %v685_v60  ;;  %v103_v0 = vrot.slane %v94_v61, %v690_v62  ;;  %v366_v8 = vld [vmem:[#allocation2 + $0x448] sm:$0xff] }
  0x56   :  { %318 = vmatpush2.msra.mxu1 %v211_v1  ;;  %411 = vmatpush1.msra.mxu0 %v352_v9  ;;  %v365_v9 = vld [vmem:[#allocation2 + $0x418] sm:$0xff] }
  0x57   :  { %412 = vmatprep.subr.mxu0 %v351_v10  ;;  %v364_v10 = vld [vmem:[#allocation2 + $0x410] sm:$0xff] }
  0x58   :  { %413 = vmatpush1.msra.mxu0 %v350_v11  ;;  %v363_v11 = vld [vmem:[#allocation2 + $0x3e0] sm:$0xff] }
  0x59   :  { %414 = vmatprep.subr.mxu0 %v349_v12  ;;  %v362_v12 = vld [vmem:[#allocation2 + $0x3d8] sm:$0xff] }
  0x5a   :  { %415 = vmatpush1.msra.mxu0 %v348_v13  ;;  %v361_v13 = vld [vmem:[#allocation2 + $0x3a8] sm:$0xff] }
  0x5b   :  { %416 = vmatprep.subr.mxu0 %v347_v14  ;;  %v360_v14 = vld [vmem:[#allocation2 + $0x3a0] sm:$0xff] }
  0x5c   :  { %417 = vmatpush1.msra.mxu0 %v346_v15  ;;  %v508_v15 = vld [vmem:[#allocation2 + $0x6f8] sm:$0xff] }
  0x5d   :  { %418 = vmatprep.subr.mxu0 %v345_v16  ;;  %v492_v16 = vld [vmem:[#allocation2 + $0x378] sm:$0xff]  ;;  %593 = vmatprep.subr.mxu1 %v508_v15 }
  0x5e   :  { %419 = vmatpush1.msra.mxu0 %v344_v17  ;;  %v507_v17 = vld [vmem:[#allocation2 + $0x6c0] sm:$0xff] }
  0x5f   :  { %420 = vmatprep.subr.mxu0 %v343_v18  ;;  %v491_v18 = vld [vmem:[#allocation2 + $0x340] sm:$0xff] }
  0x60   :  { %421 = vmatpush1.msra.mxu0 %v342_v19  ;;  %v506_v19 = vld [vmem:[#allocation2 + $0x688] sm:$0xff] }
  0x61   :  { %422 = vmatprep.subr.mxu0 %v341_v20  ;;  %v490_v20 = vld [vmem:[#allocation2 + $0x308] sm:$0xff] }
  0x62   :  { %423 = vmatpush1.msra.mxu0 %v340_v21  ;;  %v505_v21 = vld [vmem:[#allocation2 + $0x650] sm:$0xff] }
  0x63   :  { %424 = vmatprep.subr.mxu0 %v339_v22  ;;  %v489_v22 = vld [vmem:[#allocation2 + $0x2d0] sm:$0xff] }
  0x64   :  { %425 = vmatpush1.msra.mxu0 %v338_v23  ;;  %v504_v23 = vld [vmem:[#allocation2 + $0x618] sm:$0xff] }
  0x65   :  { %426 = vmatprep.subr.mxu0 %v337_v24  ;;  %v488_v24 = vld [vmem:[#allocation2 + $0x298] sm:$0xff] }
  0x66   :  { %427 = vmatpush1.msra.mxu0 %v336_v25  ;;  %v503_v25 = vld [vmem:[#allocation2 + $0x5e0] sm:$0xff] }
  0x67   :  { %428 = vmatprep.subr.mxu0 %v335_v26  ;;  %v487_v26 = vld [vmem:[#allocation2 + $0x260] sm:$0xff] }
  0x68   :  { %429 = vmatpush1.msra.mxu0 %v334_v27  ;;  %v502_v27 = vld [vmem:[#allocation2 + $0x5a8] sm:$0xff] }
  0x69   :  { %430 = vmatprep.subr.mxu0 %v333_v28  ;;  %v486_v28 = vld [vmem:[#allocation2 + $0x228] sm:$0xff] }
  0x6a   :  { %431 = vmatpush1.msra.mxu0 %v332_v29  ;;  %v501_v29 = vld [vmem:[#allocation2 + $0x570] sm:$0xff] }
  0x6b   :  { %432 = vmatprep.subr.mxu0 %v331_v30  ;;  %v485_v30 = vld [vmem:[#allocation2 + $0x1f0] sm:$0xff] }
  0x6c   :  { %433 = vmatpush1.msra.mxu0 %v330_v31  ;;  %v500_v31 = vld [vmem:[#allocation2 + $0x538] sm:$0xff] }
  0x6d   :  { %434 = vmatprep.subr.mxu0 %v329_v32  ;;  %v484_v32 = vld [vmem:[#allocation2 + $0x1b8] sm:$0xff] }
  0x6e   :  { %435 = vmatpush1.msra.mxu0 %v328_v33  ;;  %v499_v33 = vld [vmem:[#allocation2 + $0x500] sm:$0xff] }
  0x6f   :  { %436 = vmatprep.subr.mxu0 %v391_v34  ;;  %v483_v34 = vld [vmem:[#allocation2 + $0x180] sm:$0xff] }
  0x70   :  { %437 = vmatpush2.msra.mxu0 %v390_v35  ;;  %v498_v35 = vld [vmem:[#allocation2 + $0x4c8] sm:$0xff] }
  0x71   :  { %438 = vmatprep.subr.mxu0 %v389_v36  ;;  %v482_v36 = vld [vmem:[#allocation2 + $0x148] sm:$0xff] }
  0x72   :  { %439 = vmatpush2.msra.mxu0 %v388_v37  ;;  %v497_v37 = vld [vmem:[#allocation2 + $0x490] sm:$0xff] }
  0x73   :  { %440 = vmatprep.subr.mxu0 %v387_v38  ;;  %v481_v38 = vld [vmem:[#allocation2 + $0x110] sm:$0xff] }
  0x74   :  { %441 = vmatpush2.msra.mxu0 %v386_v39  ;;  %v243_v39 = vld [vmem:[%s712_s2 + $0x2] sm:$0x3] }
  0x75   :  { %442 = vmatprep.subr.mxu0 %v385_v40  ;;  %v248_v40 = vrot.slane %v243_v39, %v685_v60 }
  0x76   :  { %443 = vmatpush2.msra.mxu0 %v384_v41  ;;  %v252_v41 = vrot.slane %v243_v39, %v690_v62 }
  0x77   :  { %444 = vmatprep.subr.mxu0 %v383_v42 }
  0x78   :  { %445 = vmatpush2.msra.mxu0 %v382_v43 }
  0x79   :  { %446 = vmatprep.subr.mxu0 %v381_v44 }
  0x7a   :  { %447 = vmatpush2.msra.mxu0 %v380_v45 }
  0x7b   :  { %448 = vmatprep.subr.mxu0 %v379_v46 }
  0x7c   :  { %449 = vmatpush2.msra.mxu0 %v378_v47 }
  0x7d   :  { %450 = vmatprep.subr.mxu0 %v377_v48  ;;  %v496_v48 = vld [vmem:[#allocation2 + $0x458] sm:$0xff] }
  0x7e   :  { %451 = vmatpush2.msra.mxu0 %v376_v49  ;;  %v480_v49 = vld [vmem:[#allocation2 + $0xd8] sm:$0xff] }
  0x7f   :  { %452 = vmatprep.subr.mxu0 %v375_v50  ;;  %v495_v50 = vld [vmem:[#allocation2 + $0x420] sm:$0xff] }
  0x80   :  { %453 = vmatpush2.msra.mxu0 %v374_v51  ;;  %v479_v51 = vld [vmem:[#allocation2 + $0xa0] sm:$0xff] }
  0x81   :  { %454 = vmatprep.subr.mxu0 %v373_v52  ;;  %v494_v52 = vld [vmem:[#allocation2 + $0x3e8] sm:$0xff] }
  0x82   :  { %455 = vmatpush2.msra.mxu0 %v372_v53  ;;  %v478_v53 = vld [vmem:[#allocation2 + $0x68] sm:$0xff] }
  0x83   :  { %456 = vmatprep.subr.mxu0 %v371_v54  ;;  %v493_v54 = vld [vmem:[#allocation2 + $0x3b0] sm:$0xff] }
  0x84   :  { %457 = vmatpush2.msra.mxu0 %v370_v55  ;;  %v477_v55 = vld [vmem:[#allocation2 + $0x30] sm:$0xff] }
  0x85   :  { %458 = vmatprep.subr.mxu0 %v369_v56  ;;  %v392_v56 = vld [vmem:[%s712_s2 + $0x4] sm:$0x3] }
  0x86   :  { %459 = vmatpush2.msra.mxu0 %v368_v57  ;;  %v397_v57 = vrot.slane %v392_v56, %v685_v60  ;;  %v401_v58 = vrot.slane %v392_v56, %v690_v62 }
  0x87   :  { %460 = vmatprep.subr.mxu0 %v367_v7 }
  0x88   :  { %461 = vmatpush2.msra.mxu0 %v366_v8 }
  0x89   :  { %462 = vmatprep.subr.mxu0 %v365_v9 }
  0x8a   :  { %463 = vmatpush2.msra.mxu0 %v364_v10 }
  0x8b   :  { %464 = vmatprep.subr.mxu0 %v363_v11 }
  0x8c   :  { %465 = vmatpush2.msra.mxu0 %v362_v12 }
  0x8d   :  { %466 = vmatprep.subr.mxu0 %v361_v13 }
  0x8e   :  { %467 = vmatpush2.msra.mxu0 %v360_v14 }
 0x10e   :  { %v172_v1 = vpop.f32.mrf.mxu0 }
 0x10f   :  { %v173_v2 = vadd.f32 %v172_v1, %v99_v63 }
 0x110   :  { %v174_v3 = vpop.f32.mrf.mxu0 }
 0x111   :  { %v175_v4 = vadd.f32 %v174_v3, %v103_v0  ;;  %v177_v6 = vmax.f32 %v173_v2, 0.0 }
 0x113   :  { %v178_v5 = vmax.f32 %v175_v4, 0.0  ;;  %v592_v4 = vld [vmem:[%s712_s2 + $0x6] ss:$0 sm:$0xff] }
 0x115   :  { %319 = vmatprep.mubr.f32.mxu1 %v178_v5 }
 0x116   :  { %320 = vmatmul.mubr.f32.vlgmr.msra.gmra.mxu1 %v177_v6 }
 0x117   :  { %594 = vmatpush3.msra.mxu1 %v492_v16 }
 0x118   :  { %595 = vmatprep.subr.mxu1 %v507_v17 }
 0x119   :  { %596 = vmatpush3.msra.mxu1 %v491_v18 }
 0x11a   :  { %597 = vmatprep.subr.mxu1 %v506_v19 }
 0x11b   :  { %598 = vmatpush3.msra.mxu1 %v490_v20 }
 0x11c   :  { %599 = vmatprep.subr.mxu1 %v505_v21 }
 0x11d   :  { %600 = vmatpush3.msra.mxu1 %v489_v22 }
 0x11e   :  { %601 = vmatprep.subr.mxu1 %v504_v23 }
 0x11f   :  { %602 = vmatpush3.msra.mxu1 %v488_v24 }
 0x120   :  { %603 = vmatprep.subr.mxu1 %v503_v25 }
 0x121   :  { %604 = vmatpush3.msra.mxu1 %v487_v26 }
 0x122   :  { %605 = vmatprep.subr.mxu1 %v502_v27 }
 0x123   :  { %606 = vmatpush3.msra.mxu1 %v486_v28 }
 0x124   :  { %607 = vmatprep.subr.mxu1 %v501_v29 }
 0x125   :  { %608 = vmatpush3.msra.mxu1 %v485_v30 }
 0x126   :  { %609 = vmatprep.subr.mxu1 %v500_v31 }
 0x127   :  { %610 = vmatpush3.msra.mxu1 %v484_v32 }
 0x128   :  { %611 = vmatprep.subr.mxu1 %v499_v33 }
 0x129   :  { %612 = vmatpush3.msra.mxu1 %v483_v34 }
 0x12a   :  { %613 = vmatprep.subr.mxu1 %v498_v35 }
 0x12b   :  { %614 = vmatpush3.msra.mxu1 %v482_v36 }
 0x12c   :  { %615 = vmatprep.subr.mxu1 %v497_v37 }
 0x12d   :  { %616 = vmatpush3.msra.mxu1 %v481_v38 }
 0x12e   :  { %617 = vmatprep.subr.mxu1 %v496_v48 }
 0x12f   :  { %618 = vmatpush3.msra.mxu1 %v480_v49 }
 0x130   :  { %619 = vmatprep.subr.mxu1 %v495_v50 }
 0x131   :  { %620 = vmatpush3.msra.mxu1 %v479_v51 }
 0x132   :  { %621 = vmatprep.subr.mxu1 %v494_v52 }
 0x133   :  { %622 = vmatpush3.msra.mxu1 %v478_v53 }
 0x134   :  { %623 = vmatprep.subr.mxu1 %v493_v54 }
 0x135   :  { %624 = vmatpush3.msra.mxu1 %v477_v55 }
 0x1d6   :  { %v321_v42 = vpop.f32.mrf.mxu1 }
 0x1d7   :  { %v322_v43 = vadd.f32 %v321_v42, %v248_v40 }
 0x1d8   :  { %v323_v44 = vpop.f32.mrf.mxu1 }
 0x1d9   :  { %v324_v45 = vadd.f32 %v323_v44, %v252_v41  ;;  %v326_v47 = vmax.f32 %v322_v43, 0.0 }
 0x1db   :  { %v327_v46 = vmax.f32 %v324_v45, 0.0 }
 0x1dd   :  { %468 = vmatprep.mubr.f32.mxu0 %v327_v46 }
 0x1de   :  { %469 = vmatmul.mubr.f32.vlgmr.msra.gmra.mxu0 %v326_v47 }
 0x29e   :  { %v470_v59 = vpop.f32.mrf.mxu0 }
 0x29f   :  { %v471_v61 = vadd.f32 %v470_v59, %v397_v57 }
 0x2a0   :  { %v472_v63 = vpop.f32.mrf.mxu0 }
 0x2a1   :  { %v473_v0 = vadd.f32 %v472_v63, %v401_v58  ;;  %v475_v2 = vmax.f32 %v471_v61, 0.0 }
 0x2a3   :  { %v476_v1 = vmax.f32 %v473_v0, 0.0 }
 0x2a5   :  { %580 = vmatprep.mubr.f32.mxu1 %v476_v1 }
 0x2a6   :  { %581 = vmatmul.mubr.f32.vlgmr.msra.gmra.mxu1 %v475_v2 }
 0x366   :  { %v625_v3 = vpop.f32.mrf.mxu1 }
 0x368   :  { %v626_v5 = vpop.f32.mrf.mxu1 }
 0x369   :  { %v627_v6 = vadd.f32 %v626_v5, %v625_v3 }
 0x36b   :  { %v583_v7 = vadd.f32 %v627_v6, %v592_v4 }
 0x36d   :  { %586 = vst [vmem:[%s713_s3] sm:$0xff] %v583_v7 }
 0x36e   :  { %591 = vsyncpa [#allocation3], 1 }

</bundles_post_ra>
